<compile_context>
chip_gen: v7x
topology: tpu7x:2x2x1
jax: 0.10.0
libtpu: 0.0.40
codegen_flags: <defaults>
</compile_context>

<pallas_src>
import jax
import jax.numpy as jnp
from jax import lax
from jax.experimental import pallas as pl
from jax.experimental.pallas import tpu as pltpu

EPS = 1e-5
NEG_SLOPE = 0.1
HID = 128
OUT_REAL = 3
OUT_PAD = 128  # lane-dense padded output width


def _round_up(x, m):
    return (x + m - 1) // m * m


def _leaky_relu(x):
    return jnp.where(x > 0, x, NEG_SLOPE * x)


# ---------------- stage 1: h1 = x @ W1 ; accumulate BN1 batch stats ----------------
def _stage1_kernel(x_ref, w1_ref, h1_ref, s_ref, ss_ref):
    @pl.when(pl.program_id(0) == 0)
    def _():
        s_ref[...] = jnp.zeros_like(s_ref)
        ss_ref[...] = jnp.zeros_like(ss_ref)

    h = jnp.dot(x_ref[...].astype(jnp.bfloat16), w1_ref[...],
                preferred_element_type=jnp.float32)
    h1_ref[...] = h
    s_ref[...] += jnp.sum(h, axis=0, keepdims=True)
    ss_ref[...] += jnp.sum(h * h, axis=0, keepdims=True)


# ---- stage 2: y = leaky(h1*a1+b1) ; h2 = y @ W2 ; accumulate BN2 batch stats ------
def _make_stage2_kernel(tile_b, b_actual, b_padded):
    def kernel(h1_ref, a_ref, b_ref, w2_ref, h2_ref, s_ref, ss_ref):
        i = pl.program_id(0)

        @pl.when(i == 0)
        def _():
            s_ref[...] = jnp.zeros_like(s_ref)
            ss_ref[...] = jnp.zeros_like(ss_ref)

        y = _leaky_relu(h1_ref[...] * a_ref[...] + b_ref[...])
        if b_padded != b_actual:
            # zero padded batch rows so they don't pollute BN2 statistics
            row = i * tile_b + lax.broadcasted_iota(jnp.int32, (tile_b, 1), 0)
            y = jnp.where(row < b_actual, y, 0.0)
        h = jnp.dot(y.astype(jnp.bfloat16), w2_ref[...],
                    preferred_element_type=jnp.float32)
        h2_ref[...] = h
        s_ref[...] += jnp.sum(h, axis=0, keepdims=True)
        ss_ref[...] += jnp.sum(h * h, axis=0, keepdims=True)

    return kernel


# ---------- stage 3: out = leaky(h2*a2+b2) @ W3_pad + b3_pad  (lane-dense) ----------
def _stage3_kernel(h2_ref, a_ref, b_ref, w3_ref, b3_ref, out_ref):
    y = _leaky_relu(h2_ref[...] * a_ref[...] + b_ref[...])
    out = jnp.dot(y.astype(jnp.bfloat16), w3_ref[...],
                  preferred_element_type=jnp.float32) + b3_ref[...]
    out_ref[...] = out.astype(out_ref.dtype)


def _bn_fold(s, ss, gamma, beta, n):
    """Fold train-mode BN (biased var) into per-feature scale/shift: y = x*a + b."""
    mean = s / n
    var = ss / n - mean * mean
    inv = lax.rsqrt(var + EPS)
    a = gamma * inv
    return a, beta - mean * a


def domain_net_forward(x, params, tile_b=512):
    """x: [B, dim] float32; params: see init_params. Returns [B, 3] float32."""
    B, dim = x.shape
    tb = min(tile_b, _round_up(B, 8))
    b_pad = _round_up(B, tb)
    if b_pad != B:
        x = jnp.pad(x, ((0, b_pad - B), (0, 0)))
    n_tiles = b_pad // tb

    f32 = jnp.float32
    row2 = lambda i: (i, 0)
    const2 = lambda i: (0, 0)
    arb = pltpu.CompilerParams(dimension_semantics=("arbitrary",))
    par = pltpu.CompilerParams(dimension_semantics=("parallel",))

    # ----- stage 1 -----
    h1, s1, ss1 = pl.pallas_call(
        _stage1_kernel,
        grid=(n_tiles,),
        in_specs=[pl.BlockSpec((tb, dim), row2),
                  pl.BlockSpec((dim, HID), const2)],
        out_specs=(pl.BlockSpec((tb, HID), row2),
                   pl.BlockSpec((1, HID), const2),
                   pl.BlockSpec((1, HID), const2)),
        out_shape=(jax.ShapeDtypeStruct((b_pad, HID), f32),
                   jax.ShapeDtypeStruct((1, HID), f32),
                   jax.ShapeDtypeStruct((1, HID), f32)),
        compiler_params=arb,
        cost_estimate=pl.CostEstimate(
            flops=2 * b_pad * dim * HID + 3 * b_pad * HID,
            transcendentals=0,
            bytes_accessed=b_pad * dim * 4 + dim * HID * 2
            + b_pad * HID * 4 + 2 * HID * 4),
    )(x, params["w1"])

    a1, b1 = _bn_fold(s1, ss1, params["g1"], params["be1"], B)

    # ----- stage 2 -----
    h2, s2, ss2 = pl.pallas_call(
        _make_stage2_kernel(tb, B, b_pad),
        grid=(n_tiles,),
        in_specs=[pl.BlockSpec((tb, HID), row2),
                  pl.BlockSpec((1, HID), const2),
                  pl.BlockSpec((1, HID), const2),
                  pl.BlockSpec((HID, HID), const2)],
        out_specs=(pl.BlockSpec((tb, HID), row2),
                   pl.BlockSpec((1, HID), const2),
                   pl.BlockSpec((1, HID), const2)),
        out_shape=(jax.ShapeDtypeStruct((b_pad, HID), f32),
                   jax.ShapeDtypeStruct((1, HID), f32),
                   jax.ShapeDtypeStruct((1, HID), f32)),
        compiler_params=arb,
        cost_estimate=pl.CostEstimate(
            flops=2 * b_pad * HID * HID + 7 * b_pad * HID,
            transcendentals=0,
            bytes_accessed=2 * b_pad * HID * 4 + HID * HID * 2 + 6 * HID * 4),
    )(h1, a1, b1, params["w2"])

    a2, b2 = _bn_fold(s2, ss2, params["g2"], params["be2"], B)

    # ----- stage 3 -----
    out_padded = pl.pallas_call(
        _stage3_kernel,
        grid=(n_tiles,),
        in_specs=[pl.BlockSpec((tb, HID), row2),
                  pl.BlockSpec((1, HID), const2),
                  pl.BlockSpec((1, HID), const2),
                  pl.BlockSpec((HID, OUT_PAD), const2),
                  pl.BlockSpec((1, OUT_PAD), const2)],
        out_specs=pl.BlockSpec((tb, OUT_PAD), row2),
        out_shape=jax.ShapeDtypeStruct((b_pad, OUT_PAD), f32),
        compiler_params=par,
        cost_estimate=pl.CostEstimate(
            flops=2 * b_pad * HID * OUT_PAD + 5 * b_pad * HID,
            transcendentals=0,
            bytes_accessed=b_pad * HID * 4 + HID * OUT_PAD * 2
            + b_pad * OUT_PAD * 4 + 5 * HID * 4),
    )(h2, a2, b2, params["w3"], params["b3"])

    return out_padded[:B, :OUT_REAL]


def init_params(key, dim=2048):
    """Mirror weights_init_kaiming:
      Linear: kaiming_normal_(a=0, mode='fan_out') -> std = sqrt(2/out_features), bias = 0
      BatchNorm: weight = 1, bias = 0.
    Weights are stored pre-transposed [in, out] and cast to bf16 (MXU + HBM bandwidth).
    b1/b2 are omitted (exactly cancelled by the following train-mode BatchNorm).
    w3/b3 are zero-padded from 3 to 128 output lanes for a lane-dense final store."""
    k1, k2, k3 = jax.random.split(key, 3)

    def lin_w(k, fan_in, fan_out):
        std = (2.0 / fan_out) ** 0.5
        return std * jax.random.normal(k, (fan_in, fan_out), dtype=jnp.float32)

    w1 = lin_w(k1, dim, HID).astype(jnp.bfloat16)
    w2 = lin_w(k2, HID, HID).astype(jnp.bfloat16)
    w3_real = lin_w(k3, HID, OUT_REAL)
    w3 = jnp.zeros((HID, OUT_PAD), jnp.float32).at[:, :OUT_REAL].set(w3_real)
    w3 = w3.astype(jnp.bfloat16)
    b3 = jnp.zeros((1, OUT_PAD), jnp.float32)

    ones = jnp.ones((1, HID), jnp.float32)
    zeros = jnp.zeros((1, HID), jnp.float32)
    return {"w1": w1, "w2": w2, "w3": w3, "b3": b3,
            "g1": ones, "be1": zeros, "g2": ones, "be2": zeros}


if __name__ == "__main__":
    key = jax.random.PRNGKey(0)
    kx, kp = jax.random.split(key)

    B, DIM = 8, 256  # small shapes; dim is configurable in the module
    x = jax.random.normal(kx, (B, DIM), dtype=jnp.float32)
    params = init_params(kp, dim=DIM)

    fwd = jax.jit(domain_net_forward)
    out = fwd(x, params)
    jax.block_until_ready(out)
    assert out.shape == (B, OUT_REAL)
    assert bool(jnp.all(jnp.isfinite(out)))
    print("KERNEL_OK")
</pallas_src>

<mosaic_0001>
module attributes {stable_mosaic.version = 11 : i64} {
  func.func @_stage3_kernel(%arg0: i32, %arg1: memref<8x128xf32, #tpu.memory_space<vmem>>, %arg2: memref<1x128xf32, #tpu.memory_space<vmem>>, %arg3: memref<1x128xf32, #tpu.memory_space<vmem>>, %arg4: memref<128x128xbf16, #tpu.memory_space<vmem>>, %arg5: memref<1x128xf32, #tpu.memory_space<vmem>>, %arg6: memref<8x128xf32, #tpu.memory_space<vmem>>) attributes {dimension_semantics = [#tpu.dimension_semantics<parallel>], iteration_bounds = array<i64: 1>, scalar_prefetch = 0 : i64, scratch_operands = 0 : i64, tpu.core_type = #tpu.core_type<tc>, window_params = [{transform_indices = @transform_0, window_bounds = array<i64: 8, 128>}, {pipeline_mode = #tpu.pipeline_mode<synchronous>, transform_indices = @transform_1, window_bounds = array<i64: 1, 128>}, {pipeline_mode = #tpu.pipeline_mode<synchronous>, transform_indices = @transform_2, window_bounds = array<i64: 1, 128>}, {pipeline_mode = #tpu.pipeline_mode<synchronous>, transform_indices = @transform_3, window_bounds = array<i64: 128, 128>}, {pipeline_mode = #tpu.pipeline_mode<synchronous>, transform_indices = @transform_4, window_bounds = array<i64: 1, 128>}, {transform_indices = @transform_5, window_bounds = array<i64: 8, 128>}]} {
    %c0 = arith.constant 0 : index
    %c0_0 = arith.constant 0 : index
    %0 = vector.load %arg1[%c0, %c0_0] : memref<8x128xf32, #tpu.memory_space<vmem>>, vector<8x128xf32>
    %c0_1 = arith.constant 0 : index
    %c0_2 = arith.constant 0 : index
    %1 = vector.load %arg2[%c0_1, %c0_2] : memref<1x128xf32, #tpu.memory_space<vmem>>, vector<1x128xf32>
    %2 = vector.broadcast %1 : vector<1x128xf32> to vector<8x128xf32>
    %3 = arith.mulf %0, %2 : vector<8x128xf32>
    %c0_3 = arith.constant 0 : index
    %c0_4 = arith.constant 0 : index
    %4 = vector.load %arg3[%c0_3, %c0_4] : memref<1x128xf32, #tpu.memory_space<vmem>>, vector<1x128xf32>
    %5 = vector.broadcast %4 : vector<1x128xf32> to vector<8x128xf32>
    %6 = arith.addf %3, %5 : vector<8x128xf32>
    %cst = arith.constant 0.000000e+00 : f32
    %7 = vector.broadcast %cst : f32 to vector<8x128xf32>
    %8 = arith.cmpf ogt, %6, %7 : vector<8x128xf32>
    %cst_5 = arith.constant 1.000000e-01 : f32
    %9 = vector.broadcast %cst_5 : f32 to vector<8x128xf32>
    %10 = arith.mulf %9, %6 : vector<8x128xf32>
    %11 = arith.select %8, %6, %10 : vector<8x128xi1>, vector<8x128xf32>
    %12 = arith.truncf %11 : vector<8x128xf32> to vector<8x128xbf16>
    %c0_6 = arith.constant 0 : index
    %c0_7 = arith.constant 0 : index
    %13 = vector.load %arg4[%c0_6, %c0_7] : memref<128x128xbf16, #tpu.memory_space<vmem>>, vector<128x128xbf16>
    %cst_8 = arith.constant dense<0.000000e+00> : vector<8x128xf32>
    %14 = tpu.matmul %12, %13, %cst_8 {dimension_numbers = #tpu.dot_dimension_numbers<[1], [0], [0], [1], [0, 0, 1, 1], [], []>} : vector<8x128xbf16>, vector<128x128xbf16>, vector<8x128xf32> -> vector<8x128xf32>
    %c0_9 = arith.constant 0 : index
    %c0_10 = arith.constant 0 : index
    %15 = vector.load %arg5[%c0_9, %c0_10] : memref<1x128xf32, #tpu.memory_space<vmem>>, vector<1x128xf32>
    %16 = vector.broadcast %15 : vector<1x128xf32> to vector<8x128xf32>
    %17 = arith.addf %14, %16 : vector<8x128xf32>
    %c0_11 = arith.constant 0 : index
    %c0_12 = arith.constant 0 : index
    %18 = vector.load %arg6[%c0_11, %c0_12] : memref<8x128xf32, #tpu.memory_space<vmem>>, vector<8x128xf32>
    tpu.vector_store %arg6[%c0_11, %c0_12], %17 {strides = array<i32>} : memref<8x128xf32, #tpu.memory_space<vmem>>, vector<8x128xf32>,
    return
  }
  func.func @transform_0(%arg0: i32) -> (i32, i32) {
    %c0_i32 = arith.constant 0 : i32
    %c0_i32_0 = arith.constant 0 : i32
    return %arg0, %c0_i32 : i32, i32
  }
  func.func @transform_1(%arg0: i32) -> (i32, i32) {
    %c0_i32 = arith.constant 0 : i32
    %c0_i32_0 = arith.constant 0 : i32
    %c0_i32_1 = arith.constant 0 : i32
    return %c0_i32, %c0_i32_0 : i32, i32
  }
  func.func @transform_2(%arg0: i32) -> (i32, i32) {
    %c0_i32 = arith.constant 0 : i32
    %c0_i32_0 = arith.constant 0 : i32
    %c0_i32_1 = arith.constant 0 : i32
    return %c0_i32, %c0_i32_0 : i32, i32
  }
  func.func @transform_3(%arg0: i32) -> (i32, i32) {
    %c0_i32 = arith.constant 0 : i32
    %c0_i32_0 = arith.constant 0 : i32
    %c0_i32_1 = arith.constant 0 : i32
    return %c0_i32, %c0_i32_0 : i32, i32
  }
  func.func @transform_4(%arg0: i32) -> (i32, i32) {
    %c0_i32 = arith.constant 0 : i32
    %c0_i32_0 = arith.constant 0 : i32
    %c0_i32_1 = arith.constant 0 : i32
    return %c0_i32, %c0_i32_0 : i32, i32
  }
  func.func @transform_5(%arg0: i32) -> (i32, i32) {
    %c0_i32 = arith.constant 0 : i32
    %c0_i32_0 = arith.constant 0 : i32
    return %arg0, %c0_i32 : i32, i32
  }
}

module attributes {stable_mosaic.version = 11 : i64} {
  func.func @_stage1_kernel(%arg0: i32, %arg1: memref<8x256xf32, #tpu.memory_space<vmem>>, %arg2: memref<256x128xbf16, #tpu.memory_space<vmem>>, %arg3: memref<8x128xf32, #tpu.memory_space<vmem>>, %arg4: memref<1x128xf32, #tpu.memory_space<vmem>>, %arg5: memref<1x128xf32, #tpu.memory_space<vmem>>) attributes {dimension_semantics = [#tpu.dimension_semantics<arbitrary>], iteration_bounds = array<i64: 1>, scalar_prefetch = 0 : i64, scratch_operands = 0 : i64, tpu.core_type = #tpu.core_type<tc>, window_params = [{transform_indices = @transform_0, window_bounds = array<i64: 8, 256>}, {pipeline_mode = #tpu.pipeline_mode<synchronous>, transform_indices = @transform_1, window_bounds = array<i64: 256, 128>}, {transform_indices = @transform_2, window_bounds = array<i64: 8, 128>}, {pipeline_mode = #tpu.pipeline_mode<synchronous>, transform_indices = @transform_3, window_bounds = array<i64: 1, 128>}, {pipeline_mode = #tpu.pipeline_mode<synchronous>, transform_indices = @transform_4, window_bounds = array<i64: 1, 128>}]} {
    %c0_i32 = arith.constant 0 : i32
    %0 = arith.cmpi eq, %arg0, %c0_i32 : i32
    %1 = arith.extui %0 : i1 to i32
    %c0_i32_0 = arith.constant 0 : i32
    %2 = arith.cmpi ne, %1, %c0_i32_0 : i32
    scf.if %2 {
      %cst_16 = arith.constant 0.000000e+00 : f32
      %19 = vector.broadcast %cst_16 : f32 to vector<1x128xf32>
      %c0_17 = arith.constant 0 : index
      %c0_18 = arith.constant 0 : index
      %20 = vector.load %arg4[%c0_17, %c0_18] : memref<1x128xf32, #tpu.memory_space<vmem>>, vector<1x128xf32>
      tpu.vector_store %arg4[%c0_17, %c0_18], %19 {strides = array<i32>} : memref<1x128xf32, #tpu.memory_space<vmem>>, vector<1x128xf32>,
      %cst_19 = arith.constant 0.000000e+00 : f32
      %21 = vector.broadcast %cst_19 : f32 to vector<1x128xf32>
      %c0_20 = arith.constant 0 : index
      %c0_21 = arith.constant 0 : index
      %22 = vector.load %arg5[%c0_20, %c0_21] : memref<1x128xf32, #tpu.memory_space<vmem>>, vector<1x128xf32>
      tpu.vector_store %arg5[%c0_20, %c0_21], %21 {strides = array<i32>} : memref<1x128xf32, #tpu.memory_space<vmem>>, vector<1x128xf32>,
    } else {
    }
    %c0 = arith.constant 0 : index
    %c0_1 = arith.constant 0 : index
    %3 = vector.load %arg1[%c0, %c0_1] : memref<8x256xf32, #tpu.memory_space<vmem>>, vector<8x256xf32>
    %4 = arith.truncf %3 : vector<8x256xf32> to vector<8x256xbf16>
    %c0_2 = arith.constant 0 : index
    %c0_3 = arith.constant 0 : index
    %5 = vector.load %arg2[%c0_2, %c0_3] : memref<256x128xbf16, #tpu.memory_space<vmem>>, vector<256x128xbf16>
    %cst = arith.constant dense<0.000000e+00> : vector<8x128xf32>
    %6 = tpu.matmul %4, %5, %cst {dimension_numbers = #tpu.dot_dimension_numbers<[1], [0], [0], [1], [0, 0, 1, 1], [], []>} : vector<8x256xbf16>, vector<256x128xbf16>, vector<8x128xf32> -> vector<8x128xf32>
    %c0_4 = arith.constant 0 : index
    %c0_5 = arith.constant 0 : index
    %7 = vector.load %arg3[%c0_4, %c0_5] : memref<8x128xf32, #tpu.memory_space<vmem>>, vector<8x128xf32>
    tpu.vector_store %arg3[%c0_4, %c0_5], %6 {strides = array<i32>} : memref<8x128xf32, #tpu.memory_space<vmem>>, vector<8x128xf32>,
    %c0_6 = arith.constant 0 : index
    %c0_7 = arith.constant 0 : index
    %8 = vector.load %arg4[%c0_6, %c0_7] : memref<1x128xf32, #tpu.memory_space<vmem>>, vector<1x128xf32>
    %cst_8 = arith.constant dense<0.000000e+00> : vector<128xf32>
    %9 = vector.multi_reduction <add>, %6, %cst_8 [0] : vector<8x128xf32> to vector<128xf32>
    %10 = vector.shape_cast %9 : vector<128xf32> to vector<1x128xf32>
    %11 = arith.addf %8, %10 : vector<1x128xf32>
    %c0_9 = arith.constant 0 : index
    %c0_10 = arith.constant 0 : index
    %12 = vector.load %arg4[%c0_9, %c0_10] : memref<1x128xf32, #tpu.memory_space<vmem>>, vector<1x128xf32>
    tpu.vector_store %arg4[%c0_9, %c0_10], %11 {strides = array<i32>} : memref<1x128xf32, #tpu.memory_space<vmem>>, vector<1x128xf32>,
    %c0_11 = arith.constant 0 : index
    %c0_12 = arith.constant 0 : index
    %13 = vector.load %arg5[%c0_11, %c0_12] : memref<1x128xf32, #tpu.memory_space<vmem>>, vector<1x128xf32>
    %14 = arith.mulf %6, %6 : vector<8x128xf32>
    %cst_13 = arith.constant dense<0.000000e+00> : vector<128xf32>
    %15 = vector.multi_reduction <add>, %14, %cst_13 [0] : vector<8x128xf32> to vector<128xf32>
    %16 = vector.shape_cast %15 : vector<128xf32> to vector<1x128xf32>
    %17 = arith.addf %13, %16 : vector<1x128xf32>
    %c0_14 = arith.constant 0 : index
    %c0_15 = arith.constant 0 : index
    %18 = vector.load %arg5[%c0_14, %c0_15] : memref<1x128xf32, #tpu.memory_space<vmem>>, vector<1x128xf32>
    tpu.vector_store %arg5[%c0_14, %c0_15], %17 {strides = array<i32>} : memref<1x128xf32, #tpu.memory_space<vmem>>, vector<1x128xf32>,
    return
  }
  func.func @transform_0(%arg0: i32) -> (i32, i32) {
    %c0_i32 = arith.constant 0 : i32
    %c0_i32_0 = arith.constant 0 : i32
    return %arg0, %c0_i32 : i32, i32
  }
  func.func @transform_1(%arg0: i32) -> (i32, i32) {
    %c0_i32 = arith.constant 0 : i32
    %c0_i32_0 = arith.constant 0 : i32
    %c0_i32_1 = arith.constant 0 : i32
    return %c0_i32, %c0_i32_0 : i32, i32
  }
  func.func @transform_2(%arg0: i32) -> (i32, i32) {
    %c0_i32 = arith.constant 0 : i32
    %c0_i32_0 = arith.constant 0 : i32
    return %arg0, %c0_i32 : i32, i32
  }
  func.func @transform_3(%arg0: i32) -> (i32, i32) {
    %c0_i32 = arith.constant 0 : i32
    %c0_i32_0 = arith.constant 0 : i32
    %c0_i32_1 = arith.constant 0 : i32
    return %c0_i32, %c0_i32_0 : i32, i32
  }
  func.func @transform_4(%arg0: i32) -> (i32, i32) {
    %c0_i32 = arith.constant 0 : i32
    %c0_i32_0 = arith.constant 0 : i32
    %c0_i32_1 = arith.constant 0 : i32
    return %c0_i32, %c0_i32_0 : i32, i32
  }
}

module attributes {stable_mosaic.version = 11 : i64} {
  func.func @kernel(%arg0: i32, %arg1: memref<8x128xf32, #tpu.memory_space<vmem>>, %arg2: memref<1x128xf32, #tpu.memory_space<vmem>>, %arg3: memref<1x128xf32, #tpu.memory_space<vmem>>, %arg4: memref<128x128xbf16, #tpu.memory_space<vmem>>, %arg5: memref<8x128xf32, #tpu.memory_space<vmem>>, %arg6: memref<1x128xf32, #tpu.memory_space<vmem>>, %arg7: memref<1x128xf32, #tpu.memory_space<vmem>>) attributes {dimension_semantics = [#tpu.dimension_semantics<arbitrary>], iteration_bounds = array<i64: 1>, scalar_prefetch = 0 : i64, scratch_operands = 0 : i64, tpu.core_type = #tpu.core_type<tc>, window_params = [{transform_indices = @transform_0, window_bounds = array<i64: 8, 128>}, {pipeline_mode = #tpu.pipeline_mode<synchronous>, transform_indices = @transform_1, window_bounds = array<i64: 1, 128>}, {pipeline_mode = #tpu.pipeline_mode<synchronous>, transform_indices = @transform_2, window_bounds = array<i64: 1, 128>}, {pipeline_mode = #tpu.pipeline_mode<synchronous>, transform_indices = @transform_3, window_bounds = array<i64: 128, 128>}, {transform_indices = @transform_4, window_bounds = array<i64: 8, 128>}, {pipeline_mode = #tpu.pipeline_mode<synchronous>, transform_indices = @transform_5, window_bounds = array<i64: 1, 128>}, {pipeline_mode = #tpu.pipeline_mode<synchronous>, transform_indices = @transform_6, window_bounds = array<i64: 1, 128>}]} {
    %c0_i32 = arith.constant 0 : i32
    %0 = arith.cmpi eq, %arg0, %c0_i32 : i32
    %1 = arith.extui %0 : i1 to i32
    %c0_i32_0 = arith.constant 0 : i32
    %2 = arith.cmpi ne, %1, %c0_i32_0 : i32
    scf.if %2 {
      %cst_22 = arith.constant 0.000000e+00 : f32
      %30 = vector.broadcast %cst_22 : f32 to vector<1x128xf32>
      %c0_23 = arith.constant 0 : index
      %c0_24 = arith.constant 0 : index
      %31 = vector.load %arg6[%c0_23, %c0_24] : memref<1x128xf32, #tpu.memory_space<vmem>>, vector<1x128xf32>
      tpu.vector_store %arg6[%c0_23, %c0_24], %30 {strides = array<i32>} : memref<1x128xf32, #tpu.memory_space<vmem>>, vector<1x128xf32>,
      %cst_25 = arith.constant 0.000000e+00 : f32
      %32 = vector.broadcast %cst_25 : f32 to vector<1x128xf32>
      %c0_26 = arith.constant 0 : index
      %c0_27 = arith.constant 0 : index
      %33 = vector.load %arg7[%c0_26, %c0_27] : memref<1x128xf32, #tpu.memory_space<vmem>>, vector<1x128xf32>
      tpu.vector_store %arg7[%c0_26, %c0_27], %32 {strides = array<i32>} : memref<1x128xf32, #tpu.memory_space<vmem>>, vector<1x128xf32>,
    } else {
    }
    %c0 = arith.constant 0 : index
    %c0_1 = arith.constant 0 : index
    %3 = vector.load %arg1[%c0, %c0_1] : memref<8x128xf32, #tpu.memory_space<vmem>>, vector<8x128xf32>
    %c0_2 = arith.constant 0 : index
    %c0_3 = arith.constant 0 : index
    %4 = vector.load %arg2[%c0_2, %c0_3] : memref<1x128xf32, #tpu.memory_space<vmem>>, vector<1x128xf32>
    %5 = vector.broadcast %4 : vector<1x128xf32> to vector<8x128xf32>
    %6 = arith.mulf %3, %5 : vector<8x128xf32>
    %c0_4 = arith.constant 0 : index
    %c0_5 = arith.constant 0 : index
    %7 = vector.load %arg3[%c0_4, %c0_5] : memref<1x128xf32, #tpu.memory_space<vmem>>, vector<1x128xf32>
    %8 = vector.broadcast %7 : vector<1x128xf32> to vector<8x128xf32>
    %9 = arith.addf %6, %8 : vector<8x128xf32>
    %cst = arith.constant 0.000000e+00 : f32
    %10 = vector.broadcast %cst : f32 to vector<8x128xf32>
    %11 = arith.cmpf ogt, %9, %10 : vector<8x128xf32>
    %cst_6 = arith.constant 1.000000e-01 : f32
    %12 = vector.broadcast %cst_6 : f32 to vector<8x128xf32>
    %13 = arith.mulf %12, %9 : vector<8x128xf32>
    %14 = arith.select %11, %9, %13 : vector<8x128xi1>, vector<8x128xf32>
    %15 = arith.truncf %14 : vector<8x128xf32> to vector<8x128xbf16>
    %c0_7 = arith.constant 0 : index
    %c0_8 = arith.constant 0 : index
    %16 = vector.load %arg4[%c0_7, %c0_8] : memref<128x128xbf16, #tpu.memory_space<vmem>>, vector<128x128xbf16>
    %cst_9 = arith.constant dense<0.000000e+00> : vector<8x128xf32>
    %17 = tpu.matmul %15, %16, %cst_9 {dimension_numbers = #tpu.dot_dimension_numbers<[1], [0], [0], [1], [0, 0, 1, 1], [], []>} : vector<8x128xbf16>, vector<128x128xbf16>, vector<8x128xf32> -> vector<8x128xf32>
    %c0_10 = arith.constant 0 : index
    %c0_11 = arith.constant 0 : index
    %18 = vector.load %arg5[%c0_10, %c0_11] : memref<8x128xf32, #tpu.memory_space<vmem>>, vector<8x128xf32>
    tpu.vector_store %arg5[%c0_10, %c0_11], %17 {strides = array<i32>} : memref<8x128xf32, #tpu.memory_space<vmem>>, vector<8x128xf32>,
    %c0_12 = arith.constant 0 : index
    %c0_13 = arith.constant 0 : index
    %19 = vector.load %arg6[%c0_12, %c0_13] : memref<1x128xf32, #tpu.memory_space<vmem>>, vector<1x128xf32>
    %cst_14 = arith.constant dense<0.000000e+00> : vector<128xf32>
    %20 = vector.multi_reduction <add>, %17, %cst_14 [0] : vector<8x128xf32> to vector<128xf32>
    %21 = vector.shape_cast %20 : vector<128xf32> to vector<1x128xf32>
    %22 = arith.addf %19, %21 : vector<1x128xf32>
    %c0_15 = arith.constant 0 : index
    %c0_16 = arith.constant 0 : index
    %23 = vector.load %arg6[%c0_15, %c0_16] : memref<1x128xf32, #tpu.memory_space<vmem>>, vector<1x128xf32>
    tpu.vector_store %arg6[%c0_15, %c0_16], %22 {strides = array<i32>} : memref<1x128xf32, #tpu.memory_space<vmem>>, vector<1x128xf32>,
    %c0_17 = arith.constant 0 : index
    %c0_18 = arith.constant 0 : index
    %24 = vector.load %arg7[%c0_17, %c0_18] : memref<1x128xf32, #tpu.memory_space<vmem>>, vector<1x128xf32>
    %25 = arith.mulf %17, %17 : vector<8x128xf32>
    %cst_19 = arith.constant dense<0.000000e+00> : vector<128xf32>
    %26 = vector.multi_reduction <add>, %25, %cst_19 [0] : vector<8x128xf32> to vector<128xf32>
    %27 = vector.shape_cast %26 : vector<128xf32> to vector<1x128xf32>
    %28 = arith.addf %24, %27 : vector<1x128xf32>
    %c0_20 = arith.constant 0 : index
    %c0_21 = arith.constant 0 : index
    %29 = vector.load %arg7[%c0_20, %c0_21] : memref<1x128xf32, #tpu.memory_space<vmem>>, vector<1x128xf32>
    tpu.vector_store %arg7[%c0_20, %c0_21], %28 {strides = array<i32>} : memref<1x128xf32, #tpu.memory_space<vmem>>, vector<1x128xf32>,
    return
  }
  func.func @transform_0(%arg0: i32) -> (i32, i32) {
    %c0_i32 = arith.constant 0 : i32
    %c0_i32_0 = arith.constant 0 : i32
    return %arg0, %c0_i32 : i32, i32
  }
  func.func @transform_1(%arg0: i32) -> (i32, i32) {
    %c0_i32 = arith.constant 0 : i32
    %c0_i32_0 = arith.constant 0 : i32
    %c0_i32_1 = arith.constant 0 : i32
    return %c0_i32, %c0_i32_0 : i32, i32
  }
  func.func @transform_2(%arg0: i32) -> (i32, i32) {
    %c0_i32 = arith.constant 0 : i32
    %c0_i32_0 = arith.constant 0 : i32
    %c0_i32_1 = arith.constant 0 : i32
    return %c0_i32, %c0_i32_0 : i32, i32
  }
  func.func @transform_3(%arg0: i32) -> (i32, i32) {
    %c0_i32 = arith.constant 0 : i32
    %c0_i32_0 = arith.constant 0 : i32
    %c0_i32_1 = arith.constant 0 : i32
    return %c0_i32, %c0_i32_0 : i32, i32
  }
  func.func @transform_4(%arg0: i32) -> (i32, i32) {
    %c0_i32 = arith.constant 0 : i32
    %c0_i32_0 = arith.constant 0 : i32
    return %arg0, %c0_i32 : i32, i32
  }
  func.func @transform_5(%arg0: i32) -> (i32, i32) {
    %c0_i32 = arith.constant 0 : i32
    %c0_i32_0 = arith.constant 0 : i32
    %c0_i32_1 = arith.constant 0 : i32
    return %c0_i32, %c0_i32_0 : i32, i32
  }
  func.func @transform_6(%arg0: i32) -> (i32, i32) {
    %c0_i32 = arith.constant 0 : i32
    %c0_i32_0 = arith.constant 0 : i32
    %c0_i32_1 = arith.constant 0 : i32
    return %c0_i32, %c0_i32_0 : i32, i32
  }
}

</mosaic_0001>

<bundles_post_ra>
// kernel: domain_net_forward.5
= control target key start
LH: loop header
LB: loop body
LE: loop exit
PB: predicated region body
PF: predicated region fallthrough
CT: control target
= control target key end

     0   :  { %v208_v0 = vmov 0.0   ;;  %vm209_vm0 = vmmov 0   ;;  %s279_s3 = inlined_call_operand.vmem [shape: bf16[128,128], index: 3, kind: input, shape index: {}]   ;;  %s280_s0 = inlined_call_operand.vmem [shape: f32[8,128], index: 0, kind: input, shape index: {}]   ;;  %s281_s1 = inlined_call_operand.vmem [shape: f32[1,128], index: 1, kind: input, shape index: {}]   ;;  %s282_s2 = inlined_call_operand.vmem [shape: f32[1,128], index: 2, kind: input, shape index: {}]   ;;  %s283_s4 = inlined_call_operand.vmem [shape: f32[1,128], index: 4, kind: input, shape index: {}]   ;;  %s284_s5 = inlined_call_operand.vmem [shape: f32[8,128], index: 5, kind: output, shape index: {}]  }
   0x1   :  { %178 = vmatprep.subr.bf16.mxu0 %v208_v0  ;;  %v200_v1 = vld [vmem:[%s279_s3] sm:$0xff]   ;;  %194 = vmatprep.mubr.msk.bf16.mxu0 %vm209_vm0, %v208_v0  ;;  %v201_v2 = vld [vmem:[%s279_s3 + $0x8] sm:$0xff]   ;;  %v202_v3 = vld [vmem:[%s279_s3 + $0x10] sm:$0xff]  }
   0x2   :  { %179 = vmatpush3.bf16.msra.mxu0 %v200_v1  ;;  %v203_v4 = vld [vmem:[%s279_s3 + $0x18] sm:$0xff]   ;;  %v21_v5 = vld [vmem:[%s280_s0] sm:$0xff]  ;;  %v205_v10 = vld [vmem:[%s279_s3 + $0x28] sm:$0xff]  }
   0x3   :  { %180 = vmatprep.subr.bf16.mxu0 %v208_v0  ;;  %v158_v6 = vld [vmem:[%s281_s1] ss:$0 sm:$0xff]  ;;  %v206_v12 = vld [vmem:[%s279_s3 + $0x30] sm:$0xff]   ;;  %v207_v14 = vld [vmem:[%s279_s3 + $0x38] sm:$0xff]  }
   0x4   :  { %v204_v7 = vld [vmem:[%s279_s3 + $0x20] sm:$0xff]   ;;  %v29_v8 = vmul.f32 %v158_v6, %v21_v5 }
   0x5   :  { %v159_v9 = vld [vmem:[%s282_s2] ss:$0 sm:$0xff] }
   0x6   :  { %181 = vmatpush3.bf16.msra.mxu0 %v201_v2  ;;  %v37_v11 = vadd.f32 %v159_v9, %v29_v8  ;;  %v160_v17 = vld [vmem:[%s283_s4] ss:$0 sm:$0xff] }
   0x7   :  { %182 = vmatprep.subr.bf16.mxu0 %v208_v0 }
   0x8   :  { %v39_v13 = vmul.f32 0.1, %v37_v11  ;;  %vm38_vm1 = vcmp.gt.f32.partialorder %v37_v11, 0.0 }
   0xa   :  { %183 = vmatpush3.bf16.msra.mxu0 %v202_v3  ;;  %v40_v15 = vsel %vm38_vm1, %v37_v11, %v39_v13 }
   0xb   :  { %184 = vmatprep.subr.bf16.mxu0 %v208_v0  ;;  %v41_v16 = vpack.c.bf16 %v40_v15, %v40_v15 }
   0xe   :  { %185 = vmatpush3.bf16.msra.mxu0 %v203_v4 }
   0xf   :  { %186 = vmatprep.subr.bf16.mxu0 %v208_v0 }
  0x12   :  { %187 = vmatpush3.bf16.msra.mxu0 %v204_v7 }
  0x13   :  { %188 = vmatprep.subr.bf16.mxu0 %v208_v0 }
  0x16   :  { %189 = vmatpush3.bf16.msra.mxu0 %v205_v10 }
  0x17   :  { %190 = vmatprep.subr.bf16.mxu0 %v208_v0 }
  0x1a   :  { %191 = vmatpush3.bf16.msra.mxu0 %v206_v12 }
  0x1b   :  { %192 = vmatprep.subr.bf16.mxu0 %v208_v0 }
  0x1e   :  { %193 = vmatpush3.bf16.msra.mxu0 %v207_v14 }
  0x21   :  { %195 = vmatmul.mubr.bf16.vlgmr.msra.gmra.mrb[0].mxu0 %v41_v16 }
  0xf4   :  { %v147_v18 = vpop.f32.mrb[0].mxu0 }
  0xf5   :  { %v148_v19 = vadd.f32 %v160_v17, %v147_v18  ;;  %v196_v20 = vpop.f32.mrb[1].mxu0 }
  0xf6   :  { %v150_v21 = vpop.f32.mrb[2].mxu0 }
  0xf7   :  { %153 = vst [vmem:[%s284_s5] sm:$0xff] %v148_v19  ;;  %v197_v22 = vpop.f32.mrb[3].mxu0 }

// kernel: domain_net_forward.3
= control target key start
LH: loop header
LB: loop body
LE: loop exit
PB: predicated region body
PF: predicated region fallthrough
CT: control target
= control target key end

     0   :  { %10 = vsyncpa [#allocation3], 0  ;;  %s442_s0 = inlined_call_operand.hbm [shape: f32[8,256], index: 0, kind: input, shape index: {}]   ;;  %s443_s1 = inlined_call_operand.hbm [shape: bf16[256,128], index: 1, kind: input, shape index: {}]   ;;  %s444_s2 = inlined_call_operand.vmem [shape: f32[8,128], index: 2, kind: output, shape index: {0}]   ;;  %s445_s3 = inlined_call_operand.vmem [shape: f32[1,128], index: 3, kind: output, shape index: {1}]   ;;  %s446_s4 = inlined_call_operand.vmem [shape: f32[1,128], index: 4, kind: output, shape index: {2}]  }
   0x1   :  { %11 = vsyncpa [#allocation5], 0  ;;  %s360_s15 = smov [#allocation2]   ;;  %s361_s17 = smov [#allocation4]  }
   0x2   :  { %s18_s16 = sshll.u32 %s360_s15, 4  ;;  %s27_s18 = sshll.u32 %s361_s17, 4  ;;  %s19_s16 = int_to_ptr.vmem [resolvable:$true] %s18_s16  ;;  %s390_s18 = int_to_ptr.vmem [resolvable:$true] %s27_s18 }
   0x3   :  { %s312_s21 = scalar_lea.hbm %s442_s0, 256 }
   0x4   :  { %p313_p0 = scmp.ne.s32.totalorder %s442_s0, %s312_s21  ;;  %p316_p1 = scmp.lt.u32.totalorder %s312_s21, %s442_s0 }
   0x6   :  { %p318_p2 = pnand %p316_p1, %p313_p0 }
   0x8   :  { %321 = shalt.err (!%p318_p2)
}
   0x9   :  { %s322_s26 = scalar_lea.vmem %s19_s16, 256  ;;  %p327_p4 = scmp.lt.s32.totalorder %s19_s16, %s19_s16 }
   0xa   :  { %p323_p3 = scmp.ne.s32.totalorder %s19_s16, %s322_s26  ;;  %p328_p5 = scmp.lt.s32.totalorder %s322_s26, %s322_s26 }
   0xc   :  { %p329_p6 = por %p328_p5, %p327_p4 }
   0xe   :  { %p330_p7 = pnand %p329_p6, %p323_p3 }
  0x10   :  { %333 = shalt.err (!%p330_p7)
}
  0x11   :  { %21 = dma.hbm_to_vmem [thread:$0]  %s442_s0, 256, %s19_s16, [#allocation3]  }
  0x12   :  { %s334_s5 = scalar_lea.hbm %s443_s1, 2048 }
  0x13   :  { %p335_p8 = scmp.ne.s32.totalorder %s443_s1, %s334_s5  ;;  %p338_p9 = scmp.lt.u32.totalorder %s334_s5, %s443_s1 }
  0x15   :  { %p340_p10 = pnand %p338_p9, %p335_p8 }
  0x17   :  { %343 = shalt.err (!%p340_p10)
}
  0x18   :  { %s344_s10 = scalar_lea.vmem %s390_s18, 2048  ;;  %p349_p12 = scmp.lt.s32.totalorder %s390_s18, %s390_s18 }
  0x19   :  { %p345_p11 = scmp.ne.s32.totalorder %s390_s18, %s344_s10  ;;  %p350_p13 = scmp.lt.s32.totalorder %s344_s10, %s344_s10 }
  0x1b   :  { %p351_p0 = por %p350_p13, %p349_p12 }
  0x1d   :  { %p352_p1 = pnand %p351_p0, %p345_p11 }
  0x1f   :  { %355 = shalt.err (!%p352_p1)
}
  0x20   :  { %s362_s0 = smov 64   ;;  %s363_s11 = smov 4  }
  0x21   :  { %33 = dma.hbm_to_vmem [thread:$0]  %s443_s1, 2048, %s390_s18, [#allocation5], %s362_s0, %s362_s0, %s363_s11  }
  0x22   :  { %356 = dma.done.wait [#allocation3], 256  }
  0x23   :  { %357 = vsyncadd [#allocation3], 4294967040 }
  0x24   :  { %358 = dma.done.wait [#allocation5], 2048  }
  0x25   :  { %359 = vsyncadd [#allocation5], 4294965248  ;;  %v296_v0 = vld [vmem:[#allocation4 + $0x40] sm:$0xff]   ;;  %v298_v2 = vld [vmem:[#allocation4 + $0x48] sm:$0xff]   ;;  %v364_v20 = vmov 0.0  }
  0x26   :  { %v297_v1 = vld [vmem:[#allocation4] sm:$0xff]   ;;  %269 = vmatprep.subr.bf16.mxu0 %v296_v0  ;;  %v299_v3 = vld [vmem:[#allocation4 + $0x8] sm:$0xff]   ;;  %v300_v4 = vld [vmem:[#allocation4 + $0x50] sm:$0xff]   ;;  %45 = vst [vmem:[%s445_s3] sm:$0x1] %v364_v20 }
  0x27   :  { %270 = vmatpush3.bf16.msra.mxu0 %v297_v1  ;;  %v301_v5 = vld [vmem:[#allocation4 + $0x10] sm:$0xff]   ;;  %v302_v6 = vld [vmem:[#allocation4 + $0x58] sm:$0xff]   ;;  %v304_v8 = vld [vmem:[#allocation4 + $0x60] sm:$0xff]   ;;  %46 = vst [vmem:[%s446_s4] sm:$0x1] %v364_v20 }
  0x28   :  { %271 = vmatprep.subr.bf16.mxu0 %v298_v2  ;;  %v303_v7 = vld [vmem:[#allocation4 + $0x18] sm:$0xff]   ;;  %v305_v9 = vld [vmem:[#allocation4 + $0x20] sm:$0xff]   ;;  %v306_v10 = vld [vmem:[#allocation4 + $0x68] sm:$0xff]  }
  0x29   :  { %v48_v11 = vld [vmem:[#allocation2 + $0x8] sm:$0xff]  ;;  %v307_v13 = vld [vmem:[#allocation4 + $0x28] sm:$0xff]   ;;  %v308_v14 = vld [vmem:[#allocation4 + $0x70] sm:$0xff]  }
  0x2a   :  { %v50_v12 = vpack.c.bf16 %v48_v11, %v48_v11  ;;  %v309_v15 = vld [vmem:[#allocation4 + $0x30] sm:$0xff]   ;;  %v310_v16 = vld [vmem:[#allocation4 + $0x78] sm:$0xff]  }
  0x2b   :  { %272 = vmatpush3.bf16.msra.mxu0 %v299_v3  ;;  %v311_v17 = vld [vmem:[#allocation4 + $0x38] sm:$0xff]   ;;  %v47_v18 = vld [vmem:[#allocation2] sm:$0xff] }
  0x2c   :  { %273 = vmatprep.subr.bf16.mxu0 %v300_v4  ;;  %211 = vmatprep.mubr.bf16.mxu0 %v50_v12  ;;  %v49_v19 = vpack.c.bf16 %v47_v18, %v47_v18 }
  0x2d   :  { %v220_v36 = vld [vmem:[%s445_s3] sm:$0x1] }
  0x2e   :  { %v229_v39 = vld [vmem:[%s446_s4] sm:$0x1] }
  0x2f   :  { %274 = vmatpush3.bf16.msra.mxu0 %v301_v5 }
  0x30   :  { %275 = vmatprep.subr.bf16.mxu0 %v302_v6 }
  0x33   :  { %276 = vmatpush3.bf16.msra.mxu0 %v303_v7 }
  0x34   :  { %277 = vmatprep.subr.bf16.mxu0 %v304_v8 }
  0x37   :  { %278 = vmatpush3.bf16.msra.mxu0 %v305_v9 }
  0x38   :  { %279 = vmatprep.subr.bf16.mxu0 %v306_v10 }
  0x3b   :  { %280 = vmatpush3.bf16.msra.mxu0 %v307_v13 }
  0x3c   :  { %281 = vmatprep.subr.bf16.mxu0 %v308_v14 }
  0x3f   :  { %282 = vmatpush3.bf16.msra.mxu0 %v309_v15 }
  0x40   :  { %283 = vmatprep.subr.bf16.mxu0 %v310_v16 }
  0x43   :  { %284 = vmatpush3.bf16.msra.mxu0 %v311_v17 }
  0x46   :  { %212 = vmatmul.mubr.bf16.vlgmr.msra.gmra.mrb[0].mxu0 %v49_v19 }
 0x119   :  { %v285_v21 = vpop.f32.mrb[0].mxu0 }
 0x11a   :  { %v286_v22 = vpop.f32.mrb[1].mxu0 }
 0x11b   :  { %v287_v23 = vadd.f32 %v286_v22, %v285_v21  ;;  %v288_v24 = vpop.f32.mrb[2].mxu0 }
 0x11c   :  { %v289_v25 = vpop.f32.mrb[3].mxu0 }
 0x11d   :  { %219 = vst [vmem:[%s444_s2] sm:$0xff] %v287_v23  ;;  %v221_v26 = vrot.slane %v287_v23, 4  ;;  %v230_v27 = vmul.f32 %v287_v23, %v287_v23 }
 0x11f   :  { %v222_v28 = vadd.f32 %v287_v23, %v221_v26  ;;  %v231_v29 = vrot.slane %v230_v27, 4 }
 0x121   :  { %v223_v30 = vrot.slane %v222_v28, 2  ;;  %v232_v31 = vadd.f32 %v231_v29, %v230_v27 }
 0x123   :  { %v224_v32 = vadd.f32 %v223_v30, %v222_v28  ;;  %v233_v33 = vrot.slane %v232_v31, 2 }
 0x125   :  { %v225_v34 = vrot.slane %v224_v32, 1  ;;  %v234_v35 = vadd.f32 %v233_v33, %v232_v31 }
 0x127   :  { %v226_v37 = vadd.f32 %v225_v34, %v224_v32  ;;  %v235_v38 = vrot.slane %v234_v35, 1 }
 0x129   :  { %v227_v40 = vadd.f32 %v226_v37, %v220_v36  ;;  %v236_v41 = vadd.f32 %v235_v38, %v234_v35 }
 0x12b   :  { %228 = vst [vmem:[%s445_s3] sm:$0x1] %v227_v40  ;;  %v237_v42 = vadd.f32 %v236_v41, %v229_v39 }
 0x12d   :  { %238 = vst [vmem:[%s446_s4] sm:$0x1] %v237_v42 }
 0x12e   :  { %251 = vsyncpa [#allocation3], 1 }
 0x12f   :  { %252 = vsyncpa [#allocation5], 1 }

// kernel: domain_net_forward.4
= control target key start
LH: loop header
LB: loop body
LE: loop exit
PB: predicated region body
PF: predicated region fallthrough
CT: control target
= control target key end

     0   :  { %v233_v0 = vmov 0.0   ;;  %vm234_vm0 = vmmov 0   ;;  %s324_s3 = inlined_call_operand.vmem [shape: bf16[128,128], index: 3, kind: input, shape index: {}]   ;;  %s325_s5 = inlined_call_operand.vmem [shape: f32[1,128], index: 5, kind: output, shape index: {1}]   ;;  %s326_s6 = inlined_call_operand.vmem [shape: f32[1,128], index: 6, kind: output, shape index: {2}]   ;;  %s327_s0 = inlined_call_operand.vmem [shape: f32[8,128], index: 0, kind: input, shape index: {}]   ;;  %s328_s1 = inlined_call_operand.vmem [shape: f32[1,128], index: 1, kind: input, shape index: {}]   ;;  %s329_s2 = inlined_call_operand.vmem [shape: f32[1,128], index: 2, kind: input, shape index: {}]   ;;  %s330_s4 = inlined_call_operand.vmem [shape: f32[8,128], index: 4, kind: output, shape index: {0}]  }
   0x1   :  { %203 = vmatprep.subr.bf16.mxu0 %v233_v0  ;;  %v225_v1 = vld [vmem:[%s324_s3] sm:$0xff]   ;;  %219 = vmatprep.mubr.msk.bf16.mxu0 %vm234_vm0, %v233_v0  ;;  %25 = vst [vmem:[%s325_s5] sm:$0x1] %v233_v0  ;;  %26 = vst [vmem:[%s326_s6] sm:$0x1] %v233_v0  ;;  %v226_v2 = vld [vmem:[%s324_s3 + $0x8] sm:$0xff]  }
   0x2   :  { %204 = vmatpush3.bf16.msra.mxu0 %v225_v1  ;;  %v227_v3 = vld [vmem:[%s324_s3 + $0x10] sm:$0xff]   ;;  %v228_v4 = vld [vmem:[%s324_s3 + $0x18] sm:$0xff]   ;;  %v27_v5 = vld [vmem:[%s327_s0] sm:$0xff] }
   0x3   :  { %205 = vmatprep.subr.bf16.mxu0 %v233_v0  ;;  %v184_v6 = vld [vmem:[%s328_s1] ss:$0 sm:$0xff]  ;;  %v230_v10 = vld [vmem:[%s324_s3 + $0x28] sm:$0xff]   ;;  %v231_v12 = vld [vmem:[%s324_s3 + $0x30] sm:$0xff]  }
   0x4   :  { %v229_v7 = vld [vmem:[%s324_s3 + $0x20] sm:$0xff]   ;;  %v35_v8 = vmul.f32 %v184_v6, %v27_v5  ;;  %v232_v14 = vld [vmem:[%s324_s3 + $0x38] sm:$0xff]  }
   0x5   :  { %v185_v9 = vld [vmem:[%s329_s2] ss:$0 sm:$0xff] }
   0x6   :  { %206 = vmatpush3.bf16.msra.mxu0 %v226_v2  ;;  %v43_v11 = vadd.f32 %v185_v9, %v35_v8 }
   0x7   :  { %207 = vmatprep.subr.bf16.mxu0 %v233_v0 }
   0x8   :  { %v45_v13 = vmul.f32 0.1, %v43_v11  ;;  %vm44_vm1 = vcmp.gt.f32.partialorder %v43_v11, 0.0  ;;  %v153_v31 = vld [vmem:[%s325_s5] sm:$0x1] }
   0x9   :  { %v162_v34 = vld [vmem:[%s326_s6] sm:$0x1] }
   0xa   :  { %208 = vmatpush3.bf16.msra.mxu0 %v227_v3  ;;  %v46_v15 = vsel %vm44_vm1, %v43_v11, %v45_v13 }
   0xb   :  { %209 = vmatprep.subr.bf16.mxu0 %v233_v0  ;;  %v47_v16 = vpack.c.bf16 %v46_v15, %v46_v15 }
   0xe   :  { %210 = vmatpush3.bf16.msra.mxu0 %v228_v4 }
   0xf   :  { %211 = vmatprep.subr.bf16.mxu0 %v233_v0 }
  0x12   :  { %212 = vmatpush3.bf16.msra.mxu0 %v229_v7 }
  0x13   :  { %213 = vmatprep.subr.bf16.mxu0 %v233_v0 }
  0x16   :  { %214 = vmatpush3.bf16.msra.mxu0 %v230_v10 }
  0x17   :  { %215 = vmatprep.subr.bf16.mxu0 %v233_v0 }
  0x1a   :  { %216 = vmatpush3.bf16.msra.mxu0 %v231_v12 }
  0x1b   :  { %217 = vmatprep.subr.bf16.mxu0 %v233_v0 }
  0x1e   :  { %218 = vmatpush3.bf16.msra.mxu0 %v232_v14 }
  0x21   :  { %220 = vmatmul.mubr.bf16.vlgmr.msra.gmra.mrb[0].mxu0 %v47_v16 }
  0xf4   :  { %v146_v17 = vpop.f32.mrb[0].mxu0 }
  0xf5   :  { %152 = vst [vmem:[%s330_s4] sm:$0xff] %v146_v17  ;;  %v154_v18 = vrot.slane %v146_v17, 4  ;;  %v163_v19 = vmul.f32 %v146_v17, %v146_v17  ;;  %v221_v20 = vpop.f32.mrb[1].mxu0 }
  0xf6   :  { %v149_v21 = vpop.f32.mrb[2].mxu0 }
  0xf7   :  { %v155_v22 = vadd.f32 %v154_v18, %v146_v17  ;;  %v164_v23 = vrot.slane %v163_v19, 4  ;;  %v222_v24 = vpop.f32.mrb[3].mxu0 }
  0xf9   :  { %v156_v25 = vrot.slane %v155_v22, 2  ;;  %v165_v26 = vadd.f32 %v164_v23, %v163_v19 }
  0xfb   :  { %v157_v27 = vadd.f32 %v156_v25, %v155_v22  ;;  %v166_v28 = vrot.slane %v165_v26, 2 }
  0xfd   :  { %v158_v29 = vrot.slane %v157_v27, 1  ;;  %v167_v30 = vadd.f32 %v166_v28, %v165_v26 }
  0xff   :  { %v159_v32 = vadd.f32 %v158_v29, %v157_v27  ;;  %v168_v33 = vrot.slane %v167_v30, 1 }
 0x101   :  { %v160_v35 = vadd.f32 %v159_v32, %v153_v31  ;;  %v169_v36 = vadd.f32 %v168_v33, %v167_v30 }
 0x103   :  { %161 = vst [vmem:[%s325_s5] sm:$0x1] %v160_v35  ;;  %v170_v37 = vadd.f32 %v169_v36, %v162_v34 }
 0x105   :  { %171 = vst [vmem:[%s326_s6] sm:$0x1] %v170_v37 }

</bundles_post_ra>
